<compile_context>
chip_gen: v5e
topology: v5e:2x2
jax: 0.10.0
libtpu: 0.0.40
codegen_flags: <defaults>
</compile_context>

<pallas_src>
import functools

import jax
import jax.numpy as jnp
from jax import lax
from jax.experimental import pallas as pl
from jax.experimental.pallas import tpu as pltpu

LAYER_NORM_EPS = 1e-12


def _bert_embeddings_kernel(ids_ref,              # scalar prefetch (SMEM), (B, S) int32
                            word_hbm,             # (V, H) word table, HBM (pl.ANY)
                            pos_ref,              # (tile_s, H) position slab, VMEM
                            tab_ref,              # (n_split, n_tab, H) [emotion ; token_type], VMEM
                            vads_ref,             # (1, B, tile_s) int32, VMEM
                            tok_ref,              # (1, B, tile_s) int32, VMEM
                            gamma_ref, beta_ref,  # (1, H) LayerNorm params, VMEM
                            out_ref,              # (1, tile_s, H) output block
                            wrows, wsem,          # scratch: (tile_s, H) VMEM, (tile_s,) DMA sems
                            *, tile_s, chunk_rows, n_emo, n_tab, n_split):
    i = pl.program_id(0)                 # sequence tile
    j = pl.program_id(1)                 # batch element
    s0 = i * tile_s

    # ---- Phase A: fire one row-gather DMA per token (word table HBM -> VMEM).
    # All tile_s copies go in flight before any compute so they pipeline.
    @pl.loop(0, tile_s)
    def _(r):
        wid = ids_ref[j, s0 + r]
        pltpu.make_async_copy(word_hbm.at[wid], wrows.at[r], wsem.at[r]).start()

    # ---- Phase B (overlaps the in-flight DMAs): emotion + token-type gathers
    # as one small one-hot matmul on the MXU, plus the position slab.
    # onehot_t[k, r] = (k == vads[r]) | (k == n_emo + tok[r]); contracting the
    # table axis yields emotion_emb[vads] + token_type_emb[tok] exactly (the
    # table components are bf16-exact, so any MXU pass count is lossless).
    vad_row = vads_ref[0, pl.ds(j, 1), :]                       # (1, tile_s)
    tok_row = tok_ref[0, pl.ds(j, 1), :]                        # (1, tile_s)
    row_iota = lax.broadcasted_iota(jnp.int32, (n_tab, tile_s), 0)
    onehot_t = ((row_iota == vad_row) |
                (row_iota == tok_row + n_emo)).astype(jnp.float32)   # (n_tab, tile_s)
    dn = (((0,), (0,)), ((), ()))                                # contract table axis
    small = lax.dot_general(onehot_t, tab_ref[0], dn,
                            preferred_element_type=jnp.float32)  # (tile_s, H)
    for p in range(1, n_split):
        small = small + lax.dot_general(onehot_t, tab_ref[p], dn,
                                        preferred_element_type=jnp.float32)
    small = small + pos_ref[...].astype(jnp.float32)

    # ---- Phase C: chunk-wise wait -> combine -> LayerNorm -> store, so LN on
    # early rows overlaps DMAs still streaming for later rows.
    for c in range(tile_s // chunk_rows):                        # small static count
        r0 = c * chunk_rows

        @pl.loop(r0, r0 + chunk_rows)
        def _(r):
            wid = ids_ref[j, s0 + r]                             # same descriptor as start()
            pltpu.make_async_copy(word_hbm.at[wid], wrows.at[r], wsem.at[r]).wait()

        x = wrows[r0:r0 + chunk_rows, :].astype(jnp.float32) + small[r0:r0 + chunk_rows, :]
        mean = jnp.mean(x, axis=-1, keepdims=True)
        centered = x - mean
        var = jnp.mean(centered * centered, axis=-1, keepdims=True)
        y = centered * lax.rsqrt(var + LAYER_NORM_EPS)
        y = y * gamma_ref[...].astype(jnp.float32) + beta_ref[...].astype(jnp.float32)
        out_ref[0, r0:r0 + chunk_rows, :] = y.astype(out_ref.dtype)


def _bf16_split(t, n_split):
    """Split a table into n_split bf16-exact f32 components that sum back to ~t."""
    parts, rem = [], t.astype(jnp.float32)
    for _ in range(n_split):
        p = rem.astype(jnp.bfloat16).astype(jnp.float32)
        parts.append(p)
        rem = rem - p
    return jnp.stack(parts, axis=0)


def bert_embeddings1(input_ids, vads, params, *, token_type_ids=None, tile_s=None,
                     out_dtype=jnp.float32):
    """Pallas implementation of BertEmbeddings1.forward for the module defaults.

    input_ids, vads, token_type_ids: int (B, S).  Positions are the module's
    default broadcast arange.  Tables may be f32 or bf16 (bf16 halves gather
    bandwidth; combine still runs in f32).
    """
    # TODO(synk): custom position_ids, past_key_values_length > 0 and the
    # inputs_embeds path are not implemented (module defaults only).
    B, S = input_ids.shape
    word_emb = params["word_emb"]
    pos_emb = params["pos_emb"]
    emo_emb = params["emo_emb"]
    type_emb = params["type_emb"]
    H = word_emb.shape[1]
    n_emo, n_type = emo_emb.shape[0], type_emb.shape[0]
    assert S % 8 == 0, "sequence length must be a multiple of 8"
    assert S <= pos_emb.shape[0]

    if token_type_ids is None:
        token_type_ids = jnp.zeros((B, S), jnp.int32)
    if vads is None:                        # module: emotion term skipped
        vads = jnp.zeros((B, S), jnp.int32)
        emo_emb = jnp.zeros_like(emo_emb)

    # Tile size: largest divisor of S that is a multiple of 8, capped at 256.
    if tile_s is None:
        tile_s = next(t for t in range(min(256, S), 7, -1) if S % t == 0 and t % 8 == 0)
    assert S % tile_s == 0 and tile_s % 8 == 0
    n_tiles = S // tile_s
    # Chunk size for the wait/compute overlap inside a step.
    chunk_rows = next(c for c in range(min(64, tile_s), 7, -1)
                      if tile_s % c == 0 and c % 8 == 0)

    ids = input_ids.astype(jnp.int32)
    # vads / token_type laid out so each grid step sees a full-last-two-dims
    # (1, B, tile_s) block (no (8,128) divisibility issue, no scalar loop).
    vads3 = vads.astype(jnp.int32).reshape(B, n_tiles, tile_s).transpose(1, 0, 2)
    tok3 = token_type_ids.astype(jnp.int32).reshape(B, n_tiles, tile_s).transpose(1, 0, 2)

    # Emotion + token-type tables concatenated (zero-padded to a multiple of 8
    # rows) so both gathers come out of one one-hot matmul.  f32 tables are
    # pre-split into bf16-exact components so the MXU result is exact.
    n_small = n_emo + n_type
    n_tab = ((n_small + 7) // 8) * 8
    tab = jnp.concatenate([emo_emb.astype(jnp.float32), type_emb.astype(jnp.float32)], axis=0)
    if n_tab != n_small:
        tab = jnp.concatenate([tab, jnp.zeros((n_tab - n_small, H), jnp.float32)], axis=0)
    n_split = 1 if (emo_emb.dtype == jnp.bfloat16 and type_emb.dtype == jnp.bfloat16) else 3
    tab_split = _bf16_split(tab, n_split)                       # (n_split, n_tab, H) f32

    gamma = params["ln_gamma"].reshape(1, H)
    beta = params["ln_beta"].reshape(1, H)

    kernel = functools.partial(_bert_embeddings_kernel, tile_s=tile_s,
                               chunk_rows=chunk_rows, n_emo=n_emo, n_tab=n_tab,
                               n_split=n_split)

    return pl.pallas_call(
        kernel,
        out_shape=jax.ShapeDtypeStruct((B, S, H), out_dtype),
        grid_spec=pltpu.PrefetchScalarGridSpec(
            num_scalar_prefetch=1,                                # input_ids -> SMEM (DMA addressing)
            grid=(n_tiles, B),                                    # seq tiles outer, batch inner
            in_specs=[
                pl.BlockSpec(memory_space=pl.ANY),                          # word table stays in HBM
                pl.BlockSpec((tile_s, H), lambda i, j, *_: (i, 0)),         # position slab (arange)
                pl.BlockSpec((n_split, n_tab, H), lambda i, j, *_: (0, 0, 0)),  # emo+type table (resident)
                pl.BlockSpec((1, B, tile_s), lambda i, j, *_: (i, 0, 0)),   # vads slab
                pl.BlockSpec((1, B, tile_s), lambda i, j, *_: (i, 0, 0)),   # token_type slab
                pl.BlockSpec((1, H), lambda i, j, *_: (0, 0)),              # LayerNorm gamma
                pl.BlockSpec((1, H), lambda i, j, *_: (0, 0)),              # LayerNorm beta
            ],
            out_specs=pl.BlockSpec((1, tile_s, H), lambda i, j, *_: (j, i, 0)),
            scratch_shapes=[
                pltpu.VMEM((tile_s, H), word_emb.dtype),          # gathered word rows
                pltpu.SemaphoreType.DMA((tile_s,)),               # one DMA semaphore per row copy
            ],
        ),
        compiler_params=pltpu.CompilerParams(
            dimension_semantics=("parallel", "parallel"),         # no cross-step state -> megacore-safe
            vmem_limit_bytes=32 * 1024 * 1024,
        ),
    )(ids, word_emb, pos_emb, tab_split, vads3, tok3, gamma, beta)


def _reference(input_ids, token_type_ids, position_ids, vads, params):
    emb = (jnp.take(params["word_emb"], input_ids, axis=0)
           + jnp.take(params["emo_emb"], vads, axis=0)
           + jnp.take(params["type_emb"], token_type_ids, axis=0)
           + jnp.take(params["pos_emb"], position_ids, axis=0))
    mean = jnp.mean(emb, axis=-1, keepdims=True)
    var = jnp.mean(jnp.square(emb - mean), axis=-1, keepdims=True)
    normed = (emb - mean) * lax.rsqrt(var + LAYER_NORM_EPS)
    return normed * params["ln_gamma"] + params["ln_beta"]


if __name__ == "__main__":
    # Small config consistent with the module (demo only; real BERT V=30522,
    # H=768, S=512 uses the same kernel with tile_s=256 -- don't benchmark the
    # demo shape: H=32 < 128 lanes means masked output stores here).
    B, S, H = 2, 16, 32
    VOCAB, MAX_POS, TYPE_VOCAB, N_EMOTION = 64, 16, 2, 70
    PAD_TOKEN_ID = 0

    key = jax.random.PRNGKey(0)
    k_w, k_p, k_t, k_e, k_g, k_b, k_ids, k_vads = jax.random.split(key, 8)

    word_emb = 0.02 * jax.random.normal(k_w, (VOCAB, H), jnp.float32)
    word_emb = word_emb.at[PAD_TOKEN_ID].set(0.0)                # padding_idx row is zero
    pos_emb = 0.02 * jax.random.normal(k_p, (MAX_POS, H), jnp.float32)
    type_emb = 0.02 * jax.random.normal(k_t, (TYPE_VOCAB, H), jnp.float32)
    emo_emb = 0.02 * jax.random.normal(k_e, (N_EMOTION, H), jnp.float32)
    params = dict(
        word_emb=word_emb, pos_emb=pos_emb, type_emb=type_emb, emo_emb=emo_emb,
        ln_gamma=1.0 + 0.1 * jax.random.normal(k_g, (H,), jnp.float32),
        ln_beta=0.1 * jax.random.normal(k_b, (H,), jnp.float32),
    )

    input_ids = jax.random.randint(k_ids, (B, S), 0, VOCAB, dtype=jnp.int32)
    vads = jax.random.randint(k_vads, (B, S), 0, N_EMOTION, dtype=jnp.int32)
    token_type_ids = jnp.zeros((B, S), jnp.int32)                # module default (zeros buffer)
    position_ids = jnp.broadcast_to(jnp.arange(S, dtype=jnp.int32)[None, :], (B, S))

    out = bert_embeddings1(input_ids, vads, params, token_type_ids=token_type_ids)
    out = jax.block_until_ready(out)

    ref = _reference(input_ids, token_type_ids, position_ids, vads, params)
    assert out.shape == (B, S, H)
    assert jnp.allclose(out, ref, atol=1e-5, rtol=1e-5)

    print("KERNEL_OK")
</pallas_src>

<mosaic_0001>
module attributes {stable_mosaic.version = 11 : i64} {
  func.func @_bert_embeddings_kernel(%arg0: i32, %arg1: i32, %arg2: memref<2x16xi32, #tpu.memory_space<smem>>, %arg3: memref<64x32xf32, #tpu.memory_space<any>>, %arg4: memref<16x32xf32, #tpu.memory_space<vmem>>, %arg5: memref<3x72x32xf32, #tpu.memory_space<vmem>>, %arg6: memref<1x2x16xi32, #tpu.memory_space<vmem>>, %arg7: memref<1x2x16xi32, #tpu.memory_space<vmem>>, %arg8: memref<1x32xf32, #tpu.memory_space<vmem>>, %arg9: memref<1x32xf32, #tpu.memory_space<vmem>>, %arg10: memref<1x16x32xf32, #tpu.memory_space<vmem>>, %arg11: memref<16x32xf32, #tpu.memory_space<vmem>>, %arg12: memref<16x!tpu.dma_semaphore, #tpu.memory_space<semaphore_mem>>) attributes {dimension_semantics = [#tpu.dimension_semantics<parallel>, #tpu.dimension_semantics<parallel>], iteration_bounds = array<i64: 1, 2>, scalar_prefetch = 1 : i64, scratch_operands = 2 : i64, tpu.core_type = #tpu.core_type<tc>, window_params = [{}, {transform_indices = @transform_1, window_bounds = array<i64: 16, 32>}, {pipeline_mode = #tpu.pipeline_mode<synchronous>, transform_indices = @transform_2, window_bounds = array<i64: 3, 72, 32>}, {transform_indices = @transform_3, window_bounds = array<i64: 1, 2, 16>}, {transform_indices = @transform_4, window_bounds = array<i64: 1, 2, 16>}, {pipeline_mode = #tpu.pipeline_mode<synchronous>, transform_indices = @transform_5, window_bounds = array<i64: 1, 32>}, {pipeline_mode = #tpu.pipeline_mode<synchronous>, transform_indices = @transform_6, window_bounds = array<i64: 1, 32>}, {transform_indices = @transform_7, window_bounds = array<i64: 1, 16, 32>}]} {
    %c16_i32 = arith.constant 16 : i32
    %0 = arith.muli %arg0, %c16_i32 : i32
    %c0_i32 = arith.constant 0 : i32
    %c16_i32_0 = arith.constant 16 : i32
    %1 = arith.addi %c0_i32, %c16_i32_0 : i32
    %c1_i32 = arith.constant 1 : i32
    scf.for %arg13 = %c0_i32 to %1 step %c1_i32  : i32 {
      %c1_i32_34 = arith.constant 1 : i32
      %59 = arith.muli %arg13, %c1_i32_34 : i32
      %c0_i32_35 = arith.constant 0 : i32
      %60 = arith.addi %c0_i32_35, %59 : i32
      %61 = arith.addi %0, %60 : i32
      %62 = arith.index_cast %arg1 : i32 to index
      %63 = arith.index_cast %61 : i32 to index
      %64 = memref.load %arg2[%62, %63] : memref<2x16xi32, #tpu.memory_space<smem>>
      %c0_i32_36 = arith.constant 0 : i32
      %65 = tpu.memref_slice %arg3[%64, %c0_i32_36] : memref<64x32xf32, #tpu.memory_space<any>> -> memref<1x32xf32, #tpu.memory_space<any>>
      %66 = tpu.memref_squeeze %65 : memref<1x32xf32, #tpu.memory_space<any>> -> memref<32xf32, #tpu.memory_space<any>>
      %c0_i32_37 = arith.constant 0 : i32
      %67 = tpu.memref_slice %arg11[%60, %c0_i32_37] : memref<16x32xf32, #tpu.memory_space<vmem>> -> memref<1x32xf32, #tpu.memory_space<vmem>>
      %68 = tpu.memref_squeeze %67 : memref<1x32xf32, #tpu.memory_space<vmem>> -> memref<32xf32, #tpu.memory_space<vmem>>
      %69 = tpu.memref_slice %arg12[%60] : memref<16x!tpu.dma_semaphore, #tpu.memory_space<semaphore_mem>> -> memref<1x!tpu.dma_semaphore, #tpu.memory_space<semaphore_mem>>
      %70 = tpu.memref_squeeze %69 : memref<1x!tpu.dma_semaphore, #tpu.memory_space<semaphore_mem>> -> memref<!tpu.dma_semaphore, #tpu.memory_space<semaphore_mem>>
      tpu.enqueue_dma source(%66 : memref<32xf32, #tpu.memory_space<any>>) target(%68 : memref<32xf32, #tpu.memory_space<vmem>>) target_semaphore(%70 : memref<!tpu.dma_semaphore, #tpu.memory_space<semaphore_mem>>)
    }
    %c16_i32_1 = arith.constant 16 : i32
    %c0 = arith.constant 0 : index
    %2 = arith.index_cast %arg1 : i32 to index
    %c0_2 = arith.constant 0 : index
    %3 = vector.load %arg6[%c0, %2, %c0_2] : memref<1x2x16xi32, #tpu.memory_space<vmem>>, vector<1x1x16xi32>
    %4 = vector.shape_cast %3 : vector<1x1x16xi32> to vector<1x16xi32>
    %c0_3 = arith.constant 0 : index
    %5 = arith.index_cast %arg1 : i32 to index
    %c0_4 = arith.constant 0 : index
    %6 = vector.load %arg7[%c0_3, %5, %c0_4] : memref<1x2x16xi32, #tpu.memory_space<vmem>>, vector<1x1x16xi32>
    %7 = vector.shape_cast %6 : vector<1x1x16xi32> to vector<1x16xi32>
    %8 = tpu.iota {dimensions = array<i32: 0>} : vector<72x16xi32>
    %9 = vector.broadcast %4 : vector<1x16xi32> to vector<72x16xi32>
    %10 = arith.cmpi eq, %8, %9 : vector<72x16xi32>
    %c70_i32 = arith.constant 70 : i32
    %11 = vector.broadcast %c70_i32 : i32 to vector<1x16xi32>
    %12 = arith.addi %7, %11 : vector<1x16xi32>
    %13 = vector.broadcast %12 : vector<1x16xi32> to vector<72x16xi32>
    %14 = arith.cmpi eq, %8, %13 : vector<72x16xi32>
    %15 = arith.ori %10, %14 : vector<72x16xi1>
    %16 = arith.extui %15 : vector<72x16xi1> to vector<72x16xi32>
    %17 = arith.sitofp %16 : vector<72x16xi32> to vector<72x16xf32>
    %c0_5 = arith.constant 0 : index
    %c0_6 = arith.constant 0 : index
    %c0_7 = arith.constant 0 : index
    %18 = vector.load %arg5[%c0_5, %c0_6, %c0_7] : memref<3x72x32xf32, #tpu.memory_space<vmem>>, vector<1x72x32xf32>
    %19 = vector.shape_cast %18 : vector<1x72x32xf32> to vector<72x32xf32>
    %cst = arith.constant dense<0.000000e+00> : vector<16x32xf32>
    %20 = tpu.matmul %17, %19, %cst {dimension_numbers = #tpu.dot_dimension_numbers<[0], [0], [1], [1], [0, 1, 1, 1], [], []>} : vector<72x16xf32>, vector<72x32xf32>, vector<16x32xf32> -> vector<16x32xf32>
    %c1 = arith.constant 1 : index
    %c0_8 = arith.constant 0 : index
    %c0_9 = arith.constant 0 : index
    %21 = vector.load %arg5[%c1, %c0_8, %c0_9] : memref<3x72x32xf32, #tpu.memory_space<vmem>>, vector<1x72x32xf32>
    %22 = vector.shape_cast %21 : vector<1x72x32xf32> to vector<72x32xf32>
    %cst_10 = arith.constant dense<0.000000e+00> : vector<16x32xf32>
    %23 = tpu.matmul %17, %22, %cst_10 {dimension_numbers = #tpu.dot_dimension_numbers<[0], [0], [1], [1], [0, 1, 1, 1], [], []>} : vector<72x16xf32>, vector<72x32xf32>, vector<16x32xf32> -> vector<16x32xf32>
    %24 = arith.addf %20, %23 : vector<16x32xf32>
    %c2 = arith.constant 2 : index
    %c0_11 = arith.constant 0 : index
    %c0_12 = arith.constant 0 : index
    %25 = vector.load %arg5[%c2, %c0_11, %c0_12] : memref<3x72x32xf32, #tpu.memory_space<vmem>>, vector<1x72x32xf32>
    %26 = vector.shape_cast %25 : vector<1x72x32xf32> to vector<72x32xf32>
    %cst_13 = arith.constant dense<0.000000e+00> : vector<16x32xf32>
    %27 = tpu.matmul %17, %26, %cst_13 {dimension_numbers = #tpu.dot_dimension_numbers<[0], [0], [1], [1], [0, 1, 1, 1], [], []>} : vector<72x16xf32>, vector<72x32xf32>, vector<16x32xf32> -> vector<16x32xf32>
    %28 = arith.addf %24, %27 : vector<16x32xf32>
    %c0_14 = arith.constant 0 : index
    %c0_15 = arith.constant 0 : index
    %29 = vector.load %arg4[%c0_14, %c0_15] : memref<16x32xf32, #tpu.memory_space<vmem>>, vector<16x32xf32>
    %30 = arith.addf %28, %29 : vector<16x32xf32>
    %c0_i32_16 = arith.constant 0 : i32
    %c16_i32_17 = arith.constant 16 : i32
    %31 = arith.addi %c0_i32_16, %c16_i32_17 : i32
    %c1_i32_18 = arith.constant 1 : i32
    scf.for %arg13 = %c0_i32_16 to %31 step %c1_i32_18  : i32 {
      %c1_i32_34 = arith.constant 1 : i32
      %59 = arith.muli %arg13, %c1_i32_34 : i32
      %c0_i32_35 = arith.constant 0 : i32
      %60 = arith.addi %c0_i32_35, %59 : i32
      %61 = arith.addi %0, %60 : i32
      %62 = arith.index_cast %arg1 : i32 to index
      %63 = arith.index_cast %61 : i32 to index
      %64 = memref.load %arg2[%62, %63] : memref<2x16xi32, #tpu.memory_space<smem>>
      %c0_i32_36 = arith.constant 0 : i32
      %65 = tpu.memref_slice %arg3[%64, %c0_i32_36] : memref<64x32xf32, #tpu.memory_space<any>> -> memref<1x32xf32, #tpu.memory_space<any>>
      %66 = tpu.memref_squeeze %65 : memref<1x32xf32, #tpu.memory_space<any>> -> memref<32xf32, #tpu.memory_space<any>>
      %c0_i32_37 = arith.constant 0 : i32
      %67 = tpu.memref_slice %arg11[%60, %c0_i32_37] : memref<16x32xf32, #tpu.memory_space<vmem>> -> memref<1x32xf32, #tpu.memory_space<vmem>>
      %68 = tpu.memref_squeeze %67 : memref<1x32xf32, #tpu.memory_space<vmem>> -> memref<32xf32, #tpu.memory_space<vmem>>
      %69 = tpu.memref_slice %arg12[%60] : memref<16x!tpu.dma_semaphore, #tpu.memory_space<semaphore_mem>> -> memref<1x!tpu.dma_semaphore, #tpu.memory_space<semaphore_mem>>
      %70 = tpu.memref_squeeze %69 : memref<1x!tpu.dma_semaphore, #tpu.memory_space<semaphore_mem>> -> memref<!tpu.dma_semaphore, #tpu.memory_space<semaphore_mem>>
      tpu.wait_dma2 semaphore(%70 : memref<!tpu.dma_semaphore, #tpu.memory_space<semaphore_mem>>) src(%66 : memref<32xf32, #tpu.memory_space<any>>) dst(%68 : memref<32xf32, #tpu.memory_space<vmem>>)
    }
    %c16_i32_19 = arith.constant 16 : i32
    %c0_20 = arith.constant 0 : index
    %c0_21 = arith.constant 0 : index
    %32 = vector.load %arg11[%c0_20, %c0_21] : memref<16x32xf32, #tpu.memory_space<vmem>>, vector<16x32xf32>
    %33 = arith.addf %32, %30 : vector<16x32xf32>
    %cst_22 = arith.constant dense<0.000000e+00> : vector<16xf32>
    %34 = vector.multi_reduction <add>, %33, %cst_22 [1] : vector<16x32xf32> to vector<16xf32>
    %35 = vector.shape_cast %34 : vector<16xf32> to vector<16x1xf32>
    %cst_23 = arith.constant 3.200000e+01 : f32
    %36 = vector.broadcast %cst_23 : f32 to vector<16x1xf32>
    %37 = arith.divf %35, %36 : vector<16x1xf32>
    %38 = vector.broadcast %37 : vector<16x1xf32> to vector<16x32xf32>
    %39 = arith.subf %33, %38 : vector<16x32xf32>
    %40 = arith.mulf %39, %39 : vector<16x32xf32>
    %cst_24 = arith.constant dense<0.000000e+00> : vector<16xf32>
    %41 = vector.multi_reduction <add>, %40, %cst_24 [1] : vector<16x32xf32> to vector<16xf32>
    %42 = vector.shape_cast %41 : vector<16xf32> to vector<16x1xf32>
    %cst_25 = arith.constant 3.200000e+01 : f32
    %43 = vector.broadcast %cst_25 : f32 to vector<16x1xf32>
    %44 = arith.divf %42, %43 : vector<16x1xf32>
    %cst_26 = arith.constant 9.99999996E-13 : f32
    %45 = vector.broadcast %cst_26 : f32 to vector<16x1xf32>
    %46 = arith.addf %44, %45 : vector<16x1xf32>
    %47 = math.rsqrt %46 : vector<16x1xf32>
    %48 = vector.broadcast %47 : vector<16x1xf32> to vector<16x32xf32>
    %49 = arith.mulf %39, %48 : vector<16x32xf32>
    %c0_27 = arith.constant 0 : index
    %c0_28 = arith.constant 0 : index
    %50 = vector.load %arg8[%c0_27, %c0_28] : memref<1x32xf32, #tpu.memory_space<vmem>>, vector<1x32xf32>
    %51 = vector.broadcast %50 : vector<1x32xf32> to vector<16x32xf32>
    %52 = arith.mulf %49, %51 : vector<16x32xf32>
    %c0_29 = arith.constant 0 : index
    %c0_30 = arith.constant 0 : index
    %53 = vector.load %arg9[%c0_29, %c0_30] : memref<1x32xf32, #tpu.memory_space<vmem>>, vector<1x32xf32>
    %54 = vector.broadcast %53 : vector<1x32xf32> to vector<16x32xf32>
    %55 = arith.addf %52, %54 : vector<16x32xf32>
    %c0_31 = arith.constant 0 : index
    %c0_32 = arith.constant 0 : index
    %c0_33 = arith.constant 0 : index
    %56 = vector.load %arg10[%c0_31, %c0_32, %c0_33] : memref<1x16x32xf32, #tpu.memory_space<vmem>>, vector<1x16x32xf32>
    %57 = vector.shape_cast %56 : vector<1x16x32xf32> to vector<16x32xf32>
    %58 = vector.shape_cast %55 : vector<16x32xf32> to vector<1x16x32xf32>
    tpu.vector_store %arg10[%c0_31, %c0_32, %c0_33], %58 {strides = array<i32>} : memref<1x16x32xf32, #tpu.memory_space<vmem>>, vector<1x16x32xf32>,
    return
  }
  func.func @transform_1(%arg0: i32, %arg1: i32, %arg2: memref<2x16xi32, #tpu.memory_space<smem>>) -> (i32, i32) {
    %c0_i32 = arith.constant 0 : i32
    %c0_i32_0 = arith.constant 0 : i32
    return %arg0, %c0_i32 : i32, i32
  }
  func.func @transform_2(%arg0: i32, %arg1: i32, %arg2: memref<2x16xi32, #tpu.memory_space<smem>>) -> (i32, i32, i32) {
    %c0_i32 = arith.constant 0 : i32
    %c0_i32_0 = arith.constant 0 : i32
    %c0_i32_1 = arith.constant 0 : i32
    %c0_i32_2 = arith.constant 0 : i32
    return %c0_i32, %c0_i32_0, %c0_i32_1 : i32, i32, i32
  }
  func.func @transform_3(%arg0: i32, %arg1: i32, %arg2: memref<2x16xi32, #tpu.memory_space<smem>>) -> (i32, i32, i32) {
    %c0_i32 = arith.constant 0 : i32
    %c0_i32_0 = arith.constant 0 : i32
    %c0_i32_1 = arith.constant 0 : i32
    return %arg0, %c0_i32, %c0_i32_0 : i32, i32, i32
  }
  func.func @transform_4(%arg0: i32, %arg1: i32, %arg2: memref<2x16xi32, #tpu.memory_space<smem>>) -> (i32, i32, i32) {
    %c0_i32 = arith.constant 0 : i32
    %c0_i32_0 = arith.constant 0 : i32
    %c0_i32_1 = arith.constant 0 : i32
    return %arg0, %c0_i32, %c0_i32_0 : i32, i32, i32
  }
  func.func @transform_5(%arg0: i32, %arg1: i32, %arg2: memref<2x16xi32, #tpu.memory_space<smem>>) -> (i32, i32) {
    %c0_i32 = arith.constant 0 : i32
    %c0_i32_0 = arith.constant 0 : i32
    %c0_i32_1 = arith.constant 0 : i32
    return %c0_i32, %c0_i32_0 : i32, i32
  }
  func.func @transform_6(%arg0: i32, %arg1: i32, %arg2: memref<2x16xi32, #tpu.memory_space<smem>>) -> (i32, i32) {
    %c0_i32 = arith.constant 0 : i32
    %c0_i32_0 = arith.constant 0 : i32
    %c0_i32_1 = arith.constant 0 : i32
    return %c0_i32, %c0_i32_0 : i32, i32
  }
  func.func @transform_7(%arg0: i32, %arg1: i32, %arg2: memref<2x16xi32, #tpu.memory_space<smem>>) -> (i32, i32, i32) {
    %c0_i32 = arith.constant 0 : i32
    %c0_i32_0 = arith.constant 0 : i32
    return %arg1, %arg0, %c0_i32 : i32, i32, i32
  }
}

</mosaic_0001>

<bundles_post_ra>
// kernel: tpu_custom_call.1
= control target key start
LH: loop header
LB: loop body
LE: loop exit
PB: predicated region body
PF: predicated region fallthrough
CT: control target
= control target key end

     0   :  { %s1182_s30 = smov [#allocation5]   ;;  %s1493_s0 = inlined_call_operand.vmem [shape: s32[2,16], index: 0, kind: input, shape index: {}]   ;;  %s1494_s1 = inlined_call_operand.vmem [shape: f32[64,32], index: 1, kind: input, shape index: {}]   ;;  %s1495_s2 = inlined_call_operand.vmem [shape: f32[16,32], index: 2, kind: input, shape index: {}]   ;;  %s1496_s3 = inlined_call_operand.vmem [shape: f32[3,72,32], index: 3, kind: input, shape index: {}]   ;;  %s1497_s4 = inlined_call_operand.vmem [shape: s32[1,2,16], index: 4, kind: input, shape index: {}]   ;;  %s1498_s5 = inlined_call_operand.vmem [shape: s32[1,2,16], index: 5, kind: input, shape index: {}]   ;;  %s1499_s6 = inlined_call_operand.vmem [shape: f32[1,32], index: 6, kind: input, shape index: {}]   ;;  %s1500_s7 = inlined_call_operand.vmem [shape: f32[1,32], index: 7, kind: input, shape index: {}]   ;;  %s1501_s8 = inlined_call_operand.hbm [shape: f32[2,16,32], index: 8, kind: output, shape index: {}]  }
   0x1   :  { %s14_s29 = sshll.u32 %s1493_s0, 4  ;;  %s15_s29 = int_to_ptr.vmem [resolvable:$true] %s14_s29 }
   0x2   :  { %17 = dma.vmem_to_smem %s15_s29, 32, %s1182_s30, [#allocation4] }
   0x3   :  { %1142 = dma.done.wait [#allocation4], 32 }
   0x4   :  { %1143 = vsyncadd [#allocation4], 4294967264 }
   0x5   :  { %20 = sfence }
   0x6   :  { %21 = vsyncpa [#allocation7], 0 }
   0x7   :  { %23 = vsyncpa [#allocation7 + $0x1], 0  ;;  %s1235_s9 = smov 0   ;;  %s1237_s10 = smov 0  }
   0x8   :  { %s1239_s11 = smov 0   ;;  %s1241_s12 = smov 0  }
   0x9   :  { %s1243_s13 = smov 0   ;;  %s1245_s14 = smov 0  }
   0xa LB: > { %1505 = sst [smem:[#allocation12_spill]] %s1168_s13  ;;  %s912_s0 = sadd.s32 4294967295, %s1172_s14   ;;  %s1172_s14 = sphi %s1245_s14, %s29_s14   ;;  %s1168_s13 = sphi %s1243_s13, %s1511_s13   ;;  %s1164_s12 = sphi %s1241_s12, %s1510_s12   ;;  %s1160_s11 = sphi %s1239_s11, %s1514_s11   ;;  %s1156_s10 = sphi %s1237_s10, %s1513_s10   ;;  %s1152_s9 = sphi %s1235_s9, %s1512_s9  }
   0xb   : > { %s913_s15 = sadd.s32 4294967294, %s1172_s14   ;;  %s38_s16 = sadd.s32 1, %s1168_s13 }
   0xc   : > { %s191_s17 = sadd.s32 1, %s1160_s11  ;;  %p39_p0 = scmp.ge.s32.totalorder %s38_s16, 2 }
   0xd   : > { %p201_p1 = scmp.ne.s32.totalorder %s1160_s11, %s1156_s10  ;;  %p202_p2 = scmp.eq.s32.totalorder %s912_s0, 1 }
   0xe   : > { %p207_p3 = scmp.ne.s32.totalorder %s1156_s10, %s1152_s9  ;;  %s1516_s16 = smov (%p39_p0, %s38_s16), 0 }
   0xf   : > { %1506 = sst [smem:[#allocation13_spill]] %s1516_s16  ;;  %p1275_p4 = por %p202_p2, %p201_p1 }
  0x10   : > { %p208_p5 = scmp.eq.s32.totalorder %s913_s15, 1  ;;  %s186_s19 = ssub.s32 %s1168_s13, %s1516_s16 }
  0x11   : > { %p918_p6 = scmp.ge.s32.totalorder %s1172_s14, 1  ;;  %p189_p7 = scmp.eq.s32.totalorder %s186_s19, 0 }
  0x12   : > { %p1282_p8 = por %p208_p5, %p207_p3  ;;  %p258_p9 = scmp.lt.s32.totalorder %s1172_s14, 3 }
  0x13   : > { %s1288_s21 = scalar_select %p189_p7, %s1160_s11, %s191_s17  }
  0x14   : > { %p259_p10 = pnand %p918_p6, %p258_p9 }
  0x15   : > { %s1503_s22 = sand.u32 (!%p259_p10), 1, %s1156_s10   ;;  %s1174_s25 = smov (!%p259_p10), 0  }
  0x16   : > { %262 = sbr.rel (%p259_p10) target bundleno = 648 (0x288), region = 44  ;;  %s919_s23 = sshll.u32 (!%p259_p10), %s1503_s22, 4 }
  0x17   : > { %s1293_s24 = scalar_lea.vmem (!%p259_p10), [#allocation6], %s919_s23 }
  0x1b LB: >> { %s319_s26 = sshra.s32 %s1176_s25, 7  ;;  %s324_s27 = sand.u32 127, %s1176_s25  ;;  %s1176_s25 = sphi %s1174_s25, %s317_s25  }
  0x1c   : >> { %s321_s28 = sadd.s32 %s1164_s12, %s319_s26  ;;  %s328_s16 = scalar_lea.vmem [#allocation2], %s1176_s25 }
  0x1d   : >> { %s920_s29 = sshll.u32 %s321_s28, 7  ;;  %s329_s23 = scalar_lea.sflag [#allocation3], %s1176_s25 }
  0x1e   : >> { %s325_s30 = sadd.s32 %s920_s29, %s324_s27 }
  0x1f   : >> { %s326_s0 = sld [smem:[#allocation5 + %s325_s30]] }
  0x25   : >> { %s327_s19 = scalar_lea.vmem %s1494_s1, %s326_s0 }
  0x26   : >> { %v344_v0 = vld [vmem:[%s327_s19] sm:$0x1] }
  0x27   : >> { %345 = vst [vmem:[%s328_s16] sm:$0x1] %v344_v0 }
  0x28   : >> { %363 = vsyncadd %s329_s23, 16  ;;  %s317_s25 = sadd.s32 1, %s1176_s25  }
  0x29   : >> { %p314_p11 = scmp.ge.s32.totalorder %s317_s25, 16  }
  0x2a   : > { %s364_s26 = scalar_lea.vmem (%p314_p11), %s1497_s4, %s1164_s12  ;;  %s366_s29 = scalar_lea.vmem (%p314_p11), %s1498_s5, %s1164_s12  ;;  %v368_v1 = vlaneseq (%p314_p11)  ;;  %v1183_v8 = vmov (%p314_p11), 0.0   ;;  %v938_v20 = vld [vmem:[%s1496_s3 + $0x88] sm:$0xff] (%p314_p11)  ;;  %v434_v21 = vld [vmem:[%s1496_s3 + $0x40] sm:$0xff] (%p314_p11)  ;;  %v951_v22 = vld [vmem:[%s1496_s3 + $0xd0] sm:$0xff] (%p314_p11) }
  0x2b   : > { %316 = sbr.rel (!%p314_p11) target bundleno = 27 (0x1b), region = 156  ;;  %v367_v2 = vld [vmem:[%s366_s29] sm:$0x1] (%p314_p11)  ;;  %491 = vmatpush.msra.mxu0 (%p314_p11), %v938_v20  ;;  %514 = vmatpush.msra.mxu1 (%p314_p11), %v434_v21  ;;  %v433_v24 = vld [vmem:[%s1496_s3 + $0x38] sm:$0xff] (%p314_p11)  ;;  %v950_v25 = vld [vmem:[%s1496_s3 + $0xc8] sm:$0xff] (%p314_p11)  ;;  %s1178_s22 = smov (%p314_p11), 0  }
  0x2c   : > { %v1307_v3 = vld [vmem:[%s364_s26] ss:$0 sm:$0xff] (%p314_p11)  ;;  %v1309_v4 = vshrl.u32 (%p314_p11), %v368_v1, 7  ;;  %v388_v5 = vadd.s32 (%p314_p11), 70, %v367_v2  ;;  %547 = vmatpush.msra.mxu2 (%p314_p11), %v951_v22  ;;  %v936_v26 = vld [vmem:[%s1496_s3 + $0x78] sm:$0xff] (%p314_p11)  ;;  %v432_v27 = vld [vmem:[%s1496_s3 + $0x30] sm:$0xff] (%p314_p11)  ;;  %976 = vmatpush.msra.mxu3 (%p314_p11), %v938_v20 }
  0x2d   : > { %v937_v23 = vld [vmem:[%s1496_s3 + $0x80] sm:$0xff] (%p314_p11)  ;;  %515 = vmatpush.msra.mxu1 (%p314_p11), %v433_v24  ;;  %v935_v30 = vld [vmem:[%s1496_s3 + $0x70] sm:$0xff] (%p314_p11)  ;;  %v431_v31 = vld [vmem:[%s1496_s3 + $0x28] sm:$0xff] (%p314_p11) }
  0x2e   : > { %vm379_vm0 = vcmp.eq.s32.totalorder (%p314_p11), %v1309_v4, %v1307_v3  ;;  %v1313_v6 = vperm.slane (%p314_p11), %v388_v5, 0  ;;  %v370_v7 = vadd.s32 (%p314_p11), 8, %v1309_v4  ;;  %v371_v10 = vadd.s32 (%p314_p11), 16, %v1309_v4  ;;  %492 = vmatpush.msra.mxu0 (%p314_p11), %v937_v23  ;;  %v949_v29 = vld [vmem:[%s1496_s3 + $0xc0] sm:$0xff] (%p314_p11)  ;;  %548 = vmatpush.msra.mxu2 (%p314_p11), %v950_v25  ;;  %v948_v33 = vld [vmem:[%s1496_s3 + $0xb8] sm:$0xff] (%p314_p11)  ;;  %v934_v34 = vld [vmem:[%s1496_s3 + $0x68] sm:$0xff] (%p314_p11) }
  0x2f   : > { %v372_v12 = vadd.s32 (%p314_p11), 24, %v1309_v4  ;;  %v373_v14 = vadd.s32 (%p314_p11), 32, %v1309_v4  ;;  %v377_v16 = vadd.s32 (%p314_p11), 64, %v1309_v4  ;;  %v374_v17 = vadd.s32 (%p314_p11), 40, %v1309_v4  ;;  %977 = vmatpush.msra.mxu3 (%p314_p11), %v937_v23  ;;  %516 = vmatpush.msra.mxu1 (%p314_p11), %v432_v27  ;;  %v430_v35 = vld [vmem:[%s1496_s3 + $0x20] sm:$0xff] (%p314_p11)  ;;  %v947_v36 = vld [vmem:[%s1496_s3 + $0xb0] sm:$0xff] (%p314_p11) }
  0x30   : > { %vm390_vm1 = vcmp.eq.s32.totalorder %v1309_v4, %v1313_v6  ;;  %vm380_vm3 = vcmp.eq.s32.totalorder %v370_v7, %v1307_v3  ;;  %vm391_vm4 = vcmp.eq.s32.totalorder %v370_v7, %v1313_v6  ;;  %vm381_vm6 = vcmp.eq.s32.totalorder %v371_v10, %v1307_v3  ;;  %493 = vmatpush.msra.mxu0 %v936_v26  ;;  %v933_v37 = vld [vmem:[%s1496_s3 + $0x60] sm:$0xff]  ;;  %v429_v38 = vld [vmem:[%s1496_s3 + $0x18] sm:$0xff]  ;;  %v946_v39 = vld [vmem:[%s1496_s3 + $0xa8] sm:$0xff] }
  0x31   : > { %vm399_vm2 = vmor %vm379_vm0, %vm390_vm1  ;;  %vm392_vm7 = vcmp.eq.s32.totalorder %v371_v10, %v1313_v6  ;;  %vm382_vm9 = vcmp.eq.s32.totalorder %v372_v12, %v1307_v3  ;;  %vm393_vm10 = vcmp.eq.s32.totalorder %v372_v12, %v1313_v6  ;;  %vm383_vm12 = vcmp.eq.s32.totalorder %v373_v14, %v1307_v3  ;;  %549 = vmatpush.msra.mxu2 %v949_v29  ;;  %v932_v40 = vld [vmem:[%s1496_s3 + $0x58] sm:$0xff]  ;;  %v428_v41 = vld [vmem:[%s1496_s3 + $0x10] sm:$0xff] }
  0x32   : > { %v921_v9 = vsel %vm399_vm2, 1.0, %v1183_v8  ;;  %vm400_vm5 = vmor %vm380_vm3, %vm391_vm4  ;;  %vm394_vm13 = vcmp.eq.s32.totalorder %v373_v14, %v1313_v6  ;;  %vm387_vm15 = vcmp.eq.s32.totalorder %v377_v16, %v1307_v3  ;;  %vm398_vm0 = vcmp.eq.s32.totalorder %v377_v16, %v1313_v6  ;;  %978 = vmatpush.msra.mxu3 %v936_v26  ;;  %494 = vmatpush.msra.mxu0 %v935_v30  ;;  %v945_v43 = vld [vmem:[%s1496_s3 + $0xa0] sm:$0xff]  ;;  %v931_v44 = vld [vmem:[%s1496_s3 + $0x50] sm:$0xff] }
  0x33   : > { %445 = vxpose.xlu0.b32.start [1/9] (short) (narrow) %v921_v9, 16  ;;  %v922_v11 = vsel %vm400_vm5, 1.0, %v1183_v8  ;;  %vm401_vm8 = vmor %vm381_vm6, %vm392_vm7  ;;  %vm384_vm2 = vcmp.eq.s32.totalorder %v374_v17, %v1307_v3  ;;  %vm395_vm3 = vcmp.eq.s32.totalorder %v374_v17, %v1313_v6  ;;  %v375_v28 = vadd.s32 48, %v1309_v4  ;;  %517 = vmatpush.msra.mxu1 %v431_v31  ;;  %v427_v45 = vld [vmem:[%s1496_s3 + $0x8] sm:$0xff]  ;;  %v944_v47 = vld [vmem:[%s1496_s3 + $0x98] sm:$0xff] }
  0x34   : > { %v923_v13 = vsel %vm401_vm8, 1.0, %v1183_v8  ;;  %vm402_vm11 = vmor %vm382_vm9, %vm393_vm10  ;;  %550 = vmatpush.msra.mxu2 %v948_v33  ;;  %495 = vmatpush.msra.mxu0 %v934_v34  ;;  %v376_v42 = vadd.s32 56, %v1309_v4  ;;  %v930_v48 = vld [vmem:[%s1496_s3 + $0x48] sm:$0xff]  ;;  %v426_v49 = vld [vmem:[%s1496_s3] sm:$0xff] }
  0x35   : > { %v924_v15 = vsel %vm402_vm11, 1.0, %v1183_v8  ;;  %vm403_vm14 = vmor %vm383_vm12, %vm394_vm13  ;;  %vm385_vm5 = vcmp.eq.s32.totalorder %v375_v28, %v1307_v3  ;;  %vm396_vm6 = vcmp.eq.s32.totalorder %v375_v28, %v1313_v6  ;;  %518 = vmatpush.msra.mxu1 %v430_v35  ;;  %979 = vmatpush.msra.mxu3 %v935_v30  ;;  %v943_v50 = vld [vmem:[%s1496_s3 + $0x90] sm:$0xff]  ;;  %vm477_vm11 = vcmask 588800   ;;  %v565_v58 = vld [vmem:[%s1495_s2] sm:$0xff] }
  0x36   : > { %vm407_vm1 = vmor %vm387_vm15, %vm398_vm0  ;;  %v925_v19 = vsel %vm403_vm14, 1.0, %v1183_v8  ;;  %551 = vmatpush.msra.mxu2 %v947_v36  ;;  %496 = vmatpush.msra.mxu0 %v933_v37  ;;  %vm386_vm8 = vcmp.eq.s32.totalorder %v376_v42, %v1307_v3  ;;  %vm397_vm9 = vcmp.eq.s32.totalorder %v376_v42, %v1313_v6  ;;  %v566_v1 = vld [vmem:[%s1495_s2 + $0x8] sm:$0xff] }
  0x37   : > { %v1338_v18 = vsel %vm407_vm1, 1.0, %v1183_v8  ;;  %vm404_vm4 = vmor %vm384_vm2, %vm395_vm3  ;;  %519 = vmatpush.msra.mxu1 %v429_v38  ;;  %980 = vmatpush.msra.mxu3 %v934_v34 }
  0x38   : > { %v926_v32 = vsel %vm404_vm4, 1.0, %v1183_v8  ;;  %vm405_vm7 = vmor %vm385_vm5, %vm396_vm6  ;;  %552 = vmatpush.msra.mxu2 %v946_v39  ;;  %497 = vmatpush.msra.mxu0 %v932_v40 }
  0x39   : > { %v927_v46 = vsel %vm405_vm7, 1.0, %v1183_v8  ;;  %520 = vmatpush.msra.mxu1 %v428_v41  ;;  %981 = vmatpush.msra.mxu3 %v933_v37  ;;  %vm406_vm10 = vmor %vm386_vm8, %vm397_vm9 }
  0x3a   : > { %553 = vmatpush.msra.mxu2 %v945_v43  ;;  %498 = vmatpush.msra.mxu0 %v931_v44  ;;  %v928_v51 = vsel %vm406_vm10, 1.0, %v1183_v8 }
  0x3b   : > { %446 = vxpose.xlu0.b32.cont [2/9] (short) (narrow) %v922_v11, 16  ;;  %521 = vmatpush.msra.mxu1 %v427_v45 }
  0x3c   : > { %554 = vmatpush.msra.mxu2 %v944_v47  ;;  %499 = vmatpush.msra.mxu0 %v930_v48 }
  0x3d   : > { %522 = vmatpush.msra.mxu1 %v426_v49  ;;  %982 = vmatpush.msra.mxu3 %v932_v40 }
  0x3e   : > { %555 = vmatpush.msra.mxu2 %v943_v50 }
  0x3f   : > { %983 = vmatpush.msra.mxu3 %v931_v44 }
  0x41   : > { %984 = vmatpush.msra.mxu3 %v930_v48 }
  0x43   : > { %447 = vxpose.xlu0.b32.cont [3/9] (short) (narrow) %v923_v13, 16 }
  0x4b   : > { %448 = vxpose.xlu0.b32.cont [4/9] (short) (narrow) %v924_v15, 16 }
  0x53   : > { %449 = vxpose.xlu0.b32.cont [5/9] (short) (narrow) %v925_v19, 16 }
  0x5b   : > { %450 = vxpose.xlu0.b32.cont [6/9] (short) (narrow) %v926_v32, 16 }
  0x63   : > { %451 = vxpose.xlu0.b32.cont [7/9] (short) (narrow) %v927_v46, 16 }
  0x6b   : > { %452 = vxpose.xlu0.b32.cont [8/9] (short) (narrow) %v928_v51, 16 }
  0x73   : > { %453 = vxpose.xlu0.b32.end [9/9] (short) (narrow) %v1338_v18, 16 }
  0xd7   : > { %v461_v52 = vpop.trf.xlu0 }
  0xd8   : > { %939 = vmatmul.msk.f32.vlgmr.msra.gmra.mxu0 %vm477_vm11, %v461_v52  ;;  %941 = vmatmul.msk.f32.vlgmr.msra.gmra.mxu1 %vm477_vm11, %v461_v52 }
  0xd9   : > { %952 = vmatmul.msk.f32.vlgmr.msra.gmra.mxu2 %vm477_vm11, %v461_v52 }
  0xdf   : > { %v462_v53 = vpop.trf.xlu0 }
  0xe0   : > { %940 = vmatmul.msk.f32.vlgmr.msra.gmra.mxu3 %vm477_vm11, %v462_v53  ;;  %942 = vmatmul.msk.f32.gmra.mxu1 %vm477_vm11, %v462_v53 }
  0xe1   : > { %953 = vmatmul.msk.f32.gmra.mxu2 %vm477_vm11, %v462_v53 }
 0x155   : > { %v501_v54 = vpop.f32.mrf.mxu0  ;;  %v524_v55 = vpop.f32.mrf.mxu1 }
 0x156   : > { %v525_v56 = vadd.f32 %v524_v55, %v501_v54 }
 0x15c   : > { %v557_v57 = vpop.f32.mrf.mxu2 }
 0x15d   : > { %v563_v59 = vadd.f32 %v557_v57, %v525_v56  ;;  %v527_v61 = vpop.f32.mrf.mxu1 }
 0x15f   : > { %v567_v60 = vadd.f32 %v565_v58, %v563_v59 }
 0x163   : > { %v504_v62 = vpop.f32.mrf.mxu3 }
 0x164   : > { %v528_v63 = vadd.f32 %v527_v61, %v504_v62  ;;  %v560_v0 = vpop.f32.mrf.mxu2 }
 0x166   : > { %v564_v2 = vadd.f32 %v560_v0, %v528_v63 }
 0x168   : > { %v568_v3 = vadd.f32 %v566_v1, %v564_v2 }
 0x169 LB: >> { %s584_s25 = scalar_lea.sflag [#allocation3], %s1180_s22  ;;  %s1180_s22 = sphi %s1178_s22, %s574_s22  }
 0x16a   : >> { %1144 = dma.done.wait %s584_s25, 16 }
 0x16b   : >> { %1145 = vsyncadd %s584_s25, 4294967280  ;;  %s574_s22 = sadd.s32 1, %s1180_s22  }
 0x16c   : >> { %p571_p12 = scmp.ge.s32.totalorder %s574_s22, 16  }
 0x16d   : > { %v587_v4 = vld [vmem:[#allocation2] sm:$0xff] (%p571_p12)  ;;  %vm591_vm12 = vcmask (%p571_p12), 261120   ;;  %v588_v6 = vld [vmem:[#allocation2 + $0x8] sm:$0xff] (%p571_p12)  ;;  %v1184_v10 = vmov (%p571_p12), 32.0   ;;  %s975_s19 = sshll.u32 (%p571_p12), %s1164_s12, 4  ;;  %s672_s28 = sshll.u32 (%p571_p12), %s1293_s24, 4  ;;  %s673_s28 = int_to_ptr.vmem [resolvable:$true] %s672_s28 }
 0x16e   : > { %573 = sbr.rel (!%p571_p12) target bundleno = 361 (0x169), region = 167  ;;  %v589_v5 = vadd.f32 (%p571_p12), %v587_v4, %v567_v60  ;;  %v590_v8 = vadd.f32 (%p571_p12), %v588_v6, %v568_v3  ;;  %1064 = vrcp.f32 (%p571_p12), %v1184_v10  ;;  %v1062_v41 = vld [vmem:[%s1499_s6] ss:$0 sm:$0xff] (%p571_p12)  ;;  %s671_s27 = scalar_lea.hbm (%p571_p12), %s1501_s8, %s975_s19 }
 0x16f   : > { %v1063_v45 = vld [vmem:[%s1500_s7] ss:$0 sm:$0xff] (%p571_p12)  ;;  %s674_s29 = sshll.u32 (%p571_p12), %s671_s27, 4  ;;  %s1509_s12 = sand.u32 (%p571_p12), 1, %s1156_s10   ;;  %s675_s29 = int_to_ptr.hbm [resolvable:$true] %s674_s29 }
 0x170   : > { %v592_v7 = vsel (%p571_p12), %vm591_vm12, %v589_v5, 0.0  ;;  %v595_v9 = vsel (%p571_p12), %vm591_vm12, %v590_v8, 0.0  ;;  %s658_s13 = scalar_lea.sflag (%p571_p12), [#allocation7], %s1509_s12  ;;  %s1096_s16 = sshra.s32 (%p571_p12), %s675_s29, 4  ;;  %s1097_s16 = int_to_ptr.hbm [resolvable:$true] %s1096_s16 }
 0x171   : > { %593 = vadd.xlane.f32.xlu0 (%p571_p12), %v592_v7  ;;  %s1098_s22 = scalar_lea.hbm (%p571_p12), %s1097_s16, 16  ;;  %s1102_s0 = scalar_lea.hbm (%p571_p12), %s1501_s8, 32 }
 0x172   : > { %p1099_p13 = scmp.ne.s32.totalorder (%p571_p12), %s1097_s16, %s1098_s22  ;;  %p1103_p2 = scmp.lt.s32.totalorder (%p571_p12), %s1097_s16, %s1501_s8 }
 0x173   : > { %p1104_p3 = scmp.lt.s32.totalorder %s1102_s0, %s1098_s22 }
 0x174   : > { %v1065_v11 = vpop.eup %1064  ;;  %p1100_p0 = pnand %p1099_p13, %p1275_p4 }
 0x175   : > { %v599_v12 = vmul.f32 32.0, %v1065_v11  ;;  %vm603_vm13 = vweird.f32 %v1065_v11  ;;  %p1105_p5 = por %p1104_p3, %p1103_p2 }
 0x176   : > { %p1101_p1 = pneg %p1100_p0 }
 0x177   : > { %v600_v13 = vsub.f32 1.0, %v599_v12 }
 0x178   : > { %p1106_p6 = pnand %p1105_p5, %p1101_p1 }
 0x179   : > { %596 = vadd.xlane.f32.xlu0 %v595_v9  ;;  %v601_v14 = vmul.f32 %v1065_v11, %v600_v13 }
 0x17b   : > { %v602_v15 = vadd.f32 %v1065_v11, %v601_v14 }
 0x17d   : > { %v604_v16 = vsel %vm603_vm13, %v1065_v11, %v602_v15 }
 0x1e4   : > { %v594_v17 = vpop.xlane.xlu0 %593 }
 0x1e5   : > { %v605_v18 = vmul.f32 %v604_v16, %v594_v17 }
 0x1e7   : > { %v607_v19 = vsub.f32 %v589_v5, %v605_v18 }
 0x1e9   : > { %v609_v20 = vmul.f32 %v607_v19, %v607_v19 }
 0x1eb   : > { %v611_v21 = vsel %vm591_vm12, %v609_v20, 0.0 }
 0x1ec   : > { %612 = vadd.xlane.f32.xlu1 %v611_v21  ;;  %v597_v22 = vpop.xlane.xlu0 %596 }
 0x1ed   : > { %v606_v23 = vmul.f32 %v604_v16, %v597_v22 }
 0x1ef   : > { %v608_v24 = vsub.f32 %v590_v8, %v606_v23 }
 0x1f1   : > { %v610_v25 = vmul.f32 %v608_v24, %v608_v24 }
 0x1f3   : > { %v614_v26 = vsel %vm591_vm12, %v610_v25, 0.0 }
 0x1f4   : > { %615 = vadd.xlane.f32.xlu1 %v614_v26 }
 0x25f   : > { %v613_v27 = vpop.xlane.xlu1 %612 }
 0x260   : > { %v617_v28 = vmul.f32 %v613_v27, %v604_v16 }
 0x262   : > { %v619_v29 = vadd.f32 1e-12, %v617_v28 }
 0x264   : > { %1066 = vrsqrt.f32 %v619_v29  ;;  %vm627_vm15 = vweird.f32 %v619_v29 }
 0x267   : > { %v616_v30 = vpop.xlane.xlu1 %615 }
 0x268   : > { %v618_v31 = vmul.f32 %v616_v30, %v604_v16 }
 0x26a   : > { %v1067_v32 = vpop.eup %1066  ;;  %v620_v33 = vadd.f32 1e-12, %v618_v31 }
 0x26b   : > { %v622_v34 = vmul.f32 %v1067_v32, %v619_v29  ;;  %vm628_vm14 = vweird.f32 %v1067_v32 }
 0x26c   : > { %1068 = vrsqrt.f32 %v620_v33  ;;  %vm629_vm0 = vmor %vm627_vm15, %vm628_vm14  ;;  %vm637_vm2 = vweird.f32 %v620_v33 }
 0x26d   : > { %v623_v35 = vmul.f32 %v1067_v32, %v622_v34 }
 0x26f   : > { %v624_v36 = vmul.f32 0.5, %v623_v35 }
 0x271   : > { %v625_v37 = vsub.f32 1.5, %v624_v36 }
 0x272   : > { %v1069_v38 = vpop.eup %1068 }
 0x273   : > { %v626_v39 = vmul.f32 %v1067_v32, %v625_v37  ;;  %v632_v40 = vmul.f32 %v1069_v38, %v620_v33  ;;  %vm638_vm1 = vweird.f32 %v1069_v38 }
 0x274   : > { %vm639_vm3 = vmor %vm637_vm2, %vm638_vm1 }
 0x275   : > { %v630_v42 = vsel %vm629_vm0, %v1067_v32, %v626_v39  ;;  %v633_v43 = vmul.f32 %v1069_v38, %v632_v40 }
 0x276   : > { %v641_v44 = vmul.f32 %v630_v42, %v607_v19 }
 0x277   : > { %v634_v46 = vmul.f32 0.5, %v633_v43 }
 0x278   : > { %v647_v47 = vmul.f32 %v1062_v41, %v641_v44 }
 0x279   : > { %v635_v48 = vsub.f32 1.5, %v634_v46 }
 0x27a   : > { %v653_v49 = vadd.f32 %v1063_v45, %v647_v47 }
 0x27b   : > { %v636_v50 = vmul.f32 %v1069_v38, %v635_v48 }
 0x27c   : > { %655 = vst.msk [vmem:[%s1293_s24] sm:$0xff] %vm591_vm12, %v653_v49 }
 0x27d   : > { %v640_v51 = vsel %vm639_vm3, %v1069_v38, %v636_v50 }
 0x27e   : > { %v642_v52 = vmul.f32 %v640_v51, %v608_v24 }
 0x280   : > { %v648_v53 = vmul.f32 %v1062_v41, %v642_v52 }
 0x282   : > { %v654_v54 = vadd.f32 %v1063_v45, %v648_v53 }
 0x284   : > { %656 = vst.msk [vmem:[%s1293_s24 + $0x8] sm:$0xff] %vm591_vm12, %v654_v54 }
 0x285   : > { %1109 = shalt.err (!%p1106_p6)
}
 0x286   : > { %s1185_s24 = smov 128   ;;  %s1186_s19 = smov 8  }
 0x287   : > { %985 = dma.vmem_to_hbm [thread:$0]  (%p1275_p4), %s673_s28, 256, %s675_s29, %s658_s13, %s1185_s24, %s1185_s24, %s1186_s19  }
 0x288 PF: > { %p991_p7 = scmp.ge.s32.totalorder %s1172_s14, 2  ;;  %s689_s23 = sand.u32 1, %s1152_s9  }
 0x289   : > { %s690_s26 = scalar_lea.sflag [#allocation7], %s689_s23 }
 0x28a   : > { %p988_p9 = pnand %p991_p7, %p1282_p8 }
 0x28c   : > { %p989_p10 = pneg %p988_p9 }
 0x28e   : > { %1147 = dma.done.wait (%p989_p10), %s690_s26, 256  }
 0x28f   : > { %1149 = vsyncadd (%p989_p10), %s690_s26, 4294967040  ;;  %s29_s14 = sadd.s32 1, %s1172_s14   ;;  %s1510_s12 = sld [smem:[#allocation12_spill]] }
 0x290   : > { %p26_p11 = scmp.ge.s32.totalorder %s29_s14, 4   ;;  %s1511_s13 = sld [smem:[#allocation13_spill]] }
 0x291   : > { %s1512_s9 = smov %s1156_s10  ;;  %s1513_s10 = smov %s1160_s11 }
 0x292   : > { %s1514_s11 = smov %s1288_s21  ;;  %28 = sbr.rel (!%p26_p11) target bundleno = 10 (0xa), region = 178 }
 0x297   :  { %696 = vsyncpa [#allocation7], 1 }
 0x298   :  { %698 = vsyncpa [#allocation7 + $0x1], 1 }
 0x299   :  { %699 = vsyncmov [#allocation3] }
 0x29c   :  { %s700_s18 = vpop.sfrf %699 }
 0x29d   :  { %p959_p4 = scmp.ne.s32.totalorder %s700_s18, 0 }
 0x29f   :  { %704 = shalt.err (%p959_p4)  }
 0x2a0   :  { %706 = vsyncmov [#allocation3 + $0x1] }
 0x2a3   :  { %s707_s20 = vpop.sfrf %706 }
 0x2a4   :  { %p960_p8 = scmp.ne.s32.totalorder %s707_s20, 0 }
 0x2a6   :  { %711 = shalt.err (%p960_p8)  }
 0x2a7   :  { %713 = vsyncmov [#allocation3 + $0x2] }
 0x2aa   :  { %s714_s27 = vpop.sfrf %713 }
 0x2ab   :  { %p961_p12 = scmp.ne.s32.totalorder %s714_s27, 0 }
 0x2ad   :  { %718 = shalt.err (%p961_p12)  }
 0x2ae   :  { %720 = vsyncmov [#allocation3 + $0x3] }
 0x2b1   :  { %s721_s21 = vpop.sfrf %720 }
 0x2b2   :  { %p962_p13 = scmp.ne.s32.totalorder %s721_s21, 0 }
 0x2b4   :  { %725 = shalt.err (%p962_p13)  }
 0x2b5   :  { %727 = vsyncmov [#allocation3 + $0x4] }
 0x2b8   :  { %s728_s14 = vpop.sfrf %727 }
 0x2b9   :  { %p963_p0 = scmp.ne.s32.totalorder %s728_s14, 0 }
 0x2bb   :  { %732 = shalt.err (%p963_p0)  }
 0x2bc   :  { %734 = vsyncmov [#allocation3 + $0x5] }
 0x2bf   :  { %s735_s1 = vpop.sfrf %734 }
 0x2c0   :  { %p964_p1 = scmp.ne.s32.totalorder %s735_s1, 0 }
 0x2c2   :  { %739 = shalt.err (%p964_p1)  }
 0x2c3   :  { %741 = vsyncmov [#allocation3 + $0x6] }
 0x2c6   :  { %s742_s2 = vpop.sfrf %741 }
 0x2c7   :  { %p965_p2 = scmp.ne.s32.totalorder %s742_s2, 0 }
 0x2c9   :  { %746 = shalt.err (%p965_p2)  }
 0x2ca   :  { %748 = vsyncmov [#allocation3 + $0x7] }
 0x2cd   :  { %s749_s3 = vpop.sfrf %748 }
 0x2ce   :  { %p966_p3 = scmp.ne.s32.totalorder %s749_s3, 0 }
 0x2d0   :  { %753 = shalt.err (%p966_p3)  }
 0x2d1   :  { %755 = vsyncmov [#allocation3 + $0x8] }
 0x2d4   :  { %s756_s4 = vpop.sfrf %755 }
 0x2d5   :  { %p967_p5 = scmp.ne.s32.totalorder %s756_s4, 0 }
 0x2d7   :  { %760 = shalt.err (%p967_p5)  }
 0x2d8   :  { %762 = vsyncmov [#allocation3 + $0x9] }
 0x2db   :  { %s763_s5 = vpop.sfrf %762 }
 0x2dc   :  { %p968_p6 = scmp.ne.s32.totalorder %s763_s5, 0 }
 0x2de   :  { %767 = shalt.err (%p968_p6)  }
 0x2df   :  { %769 = vsyncmov [#allocation3 + $0xa] }
 0x2e2   :  { %s770_s6 = vpop.sfrf %769 }
 0x2e3   :  { %p969_p7 = scmp.ne.s32.totalorder %s770_s6, 0 }
 0x2e5   :  { %774 = shalt.err (%p969_p7)  }
 0x2e6   :  { %776 = vsyncmov [#allocation3 + $0xb] }
 0x2e9   :  { %s777_s7 = vpop.sfrf %776 }
 0x2ea   :  { %p970_p9 = scmp.ne.s32.totalorder %s777_s7, 0 }
 0x2ec   :  { %781 = shalt.err (%p970_p9)  }
 0x2ed   :  { %783 = vsyncmov [#allocation3 + $0xc] }
 0x2f0   :  { %s784_s8 = vpop.sfrf %783 }
 0x2f1   :  { %p971_p10 = scmp.ne.s32.totalorder %s784_s8, 0 }
 0x2f3   :  { %788 = shalt.err (%p971_p10)  }
 0x2f4   :  { %790 = vsyncmov [#allocation3 + $0xd] }
 0x2f7   :  { %s791_s9 = vpop.sfrf %790 }
 0x2f8   :  { %p972_p11 = scmp.ne.s32.totalorder %s791_s9, 0 }
 0x2fa   :  { %795 = shalt.err (%p972_p11)  }
 0x2fb   :  { %797 = vsyncmov [#allocation3 + $0xe] }
 0x2fe   :  { %s798_s10 = vpop.sfrf %797 }
 0x2ff   :  { %p973_p4 = scmp.ne.s32.totalorder %s798_s10, 0 }
 0x301   :  { %802 = shalt.err (%p973_p4)  }
 0x302   :  { %804 = vsyncmov [#allocation3 + $0xf] }
 0x305   :  { %s805_s11 = vpop.sfrf %804 }
 0x306   :  { %p974_p8 = scmp.ne.s32.totalorder %s805_s11, 0 }
 0x308   :  { %809 = shalt.err (%p974_p8)  }

</bundles_post_ra>
